<compile_context>
chip_gen: v7x
topology: tpu7x:2x2x1
jax: 0.10.0
libtpu: 0.0.40
codegen_flags: <defaults>
</compile_context>

<pallas_src>
import jax
import jax.numpy as jnp
from jax.experimental import pallas as pl
from jax.experimental.pallas import tpu as pltpu

TIMESERIES = 5    # conv in_channels
KW = 7            # conv kernel width == feature_num
CONV_OUT = 32     # conv out_channels == fc in_features
LANE = 128        # TPU lane width


def _actor_kernel(x_ref, wc_ref, bc_ref, wf_ref, bf_ref, o_ref):
    # x_ref : (TB, C, H, W)   batch tile, original NCHW layout (no wrapper transpose)
    # wc_ref: (C, W, 32)      conv weight as per-channel (W x out) matrices
    # bc_ref: (1, 32)         conv bias (f32)
    # wf_ref: (32, Apad)      fc weight, transposed, zero-padded to lane width
    # bf_ref: (1, Apad)       fc bias   (f32, zero-padded)
    # o_ref : (TB, Apad)      f32 output tile (lane-dense store)
    tb, c_in, h, w = x_ref.shape
    nrows = tb * h

    # Conv2d(kernel=(1,7)) == matmul over (channel, width); accumulate per channel
    # so the MXU sees one large (TB*H, 7) @ (7, 32) per channel. f32 accumulation.
    acc = jnp.dot(x_ref[:, 0, :, :].reshape(nrows, w), wc_ref[0],
                  preferred_element_type=jnp.float32)
    for c in range(1, c_in):
        acc = acc + jnp.dot(x_ref[:, c, :, :].reshape(nrows, w), wc_ref[c],
                            preferred_element_type=jnp.float32)
    acc = acc + bc_ref[...]                 # (TB*H, 32), f32
    hidden = jnp.tanh(acc)

    # AdaptiveAvgPool1d(1) over the movement axis, then tanh (all f32).
    pooled = jnp.mean(hidden.reshape(tb, h, hidden.shape[-1]), axis=1)   # (TB, 32)
    pooled = jnp.tanh(pooled)

    # Final linear layer; lane-dense (TB, Apad) result written once per step.
    out = jnp.dot(pooled.astype(wf_ref.dtype), wf_ref[...],
                  preferred_element_type=jnp.float32)
    o_ref[...] = (out + bf_ref[...]).astype(o_ref.dtype)


def actor_forward(x_local, conv_w, conv_b, fc_w, fc_b, *,
                  compute_dtype=jnp.bfloat16, batch_tile=64):
    """x_local: (*env_batch_nagents, timeseries=5, movement, feature_num=7)."""
    env_batch_nagents = x_local.shape[:-3]
    ts, mov, feat = x_local.shape[-3:]
    assert ts == TIMESERIES and feat == KW, "module requires timeseries=5, feature_num=7"
    assert mov % 8 == 0, "movement axis must be a multiple of 8 for tile-aligned reshapes"
    # TODO(synk): support movement % 8 != 0 (needs padded rows plus a masked mean).

    # Pure reshape (no transpose, no extra HBM pass); cast once for halved DMA bytes.
    x = x_local.reshape(-1, ts, mov, feat).astype(compute_dtype)    # (B, C, H, W)
    B = x.shape[0]

    # Conv weight as per-channel (W, 32) matrices: wc[c, w, o] = conv_w[o, c, 0, w].
    wc = jnp.transpose(conv_w.reshape(CONV_OUT, ts, feat), (1, 2, 0)).astype(compute_dtype)
    bc = conv_b.reshape(1, CONV_OUT).astype(jnp.float32)

    # fc weight/bias, transposed and zero-padded to a full 128-lane output tile.
    A = fc_w.shape[0]
    a_pad = ((A + LANE - 1) // LANE) * LANE
    wf = jnp.zeros((CONV_OUT, a_pad), compute_dtype).at[:, :A].set(
        fc_w.T.astype(compute_dtype))
    bf = jnp.zeros((1, a_pad), jnp.float32).at[:, :A].set(
        fc_b[None, :].astype(jnp.float32))

    # Batch tile: TB*H >= ~1024 rows when the batch allows it; small enough to stay
    # well inside v7x's 64 MiB VMEM with double buffering, and large B still yields
    # >= 2 parallel grid steps for the two v7x TensorCores.
    tb = min(batch_tile, B)
    grid = (pl.cdiv(B, tb),)

    out = pl.pallas_call(
        _actor_kernel,
        out_shape=jax.ShapeDtypeStruct((B, a_pad), jnp.float32),
        grid_spec=pltpu.PrefetchScalarGridSpec(
            num_scalar_prefetch=0,
            grid=grid,
            in_specs=[
                pl.BlockSpec((tb, ts, mov, feat), lambda b: (b, 0, 0, 0)),
                pl.BlockSpec((ts, feat, CONV_OUT), lambda b: (0, 0, 0)),
                pl.BlockSpec((1, CONV_OUT), lambda b: (0, 0)),
                pl.BlockSpec((CONV_OUT, a_pad), lambda b: (0, 0)),
                pl.BlockSpec((1, a_pad), lambda b: (0, 0)),
            ],
            out_specs=pl.BlockSpec((tb, a_pad), lambda b: (b, 0)),
        ),
        compiler_params=pltpu.CompilerParams(
            dimension_semantics=("parallel",)),
    )(x, wc, bc, wf, bf)

    return out[:, :A].reshape(*env_batch_nagents, A)


def _reference_forward(x_local, conv_w, conv_b, fc_w, fc_b):
    """Plain-JAX float32 reference reproducing the PyTorch forward pass."""
    eb = x_local.shape[:-3]
    ts, mov, feat = x_local.shape[-3:]
    x = x_local.reshape(-1, ts, mov, feat)
    xm = jnp.transpose(x, (0, 2, 1, 3)).reshape(x.shape[0], mov, ts * feat)
    wc = conv_w.reshape(CONV_OUT, ts * feat).T
    c = jnp.tanh(xm @ wc + conv_b[None, None, :])      # conv (1,7) + tanh, squeeze(-1)
    p = jnp.tanh(jnp.mean(c, axis=1))                  # adaptive avg pool(1) + tanh
    o = p @ fc_w.T + fc_b                              # fc
    return o.reshape(*eb, -1)


if __name__ == "__main__":
    key = jax.random.PRNGKey(0)
    k1, k2, k3, k4, k5 = jax.random.split(key, 5)

    action_size = 8
    env_batch_nagents = (2, 3)   # (env_batch, n_agents)
    movement = 16

    x_local = jax.random.normal(
        k1, (*env_batch_nagents, TIMESERIES, movement, KW), jnp.float32)

    fan_conv = TIMESERIES * 1 * KW
    b_conv = 1.0 / (fan_conv ** 0.5)
    conv_w = jax.random.uniform(k2, (CONV_OUT, TIMESERIES, 1, KW), jnp.float32,
                                -b_conv, b_conv)
    conv_b = jax.random.uniform(k3, (CONV_OUT,), jnp.float32, -b_conv, b_conv)
    b_fc = 1.0 / (CONV_OUT ** 0.5)
    fc_w = jax.random.uniform(k4, (action_size, CONV_OUT), jnp.float32, -b_fc, b_fc)
    fc_b = jax.random.uniform(k5, (action_size,), jnp.float32, -b_fc, b_fc)

    ref = _reference_forward(x_local, conv_w, conv_b, fc_w, fc_b)

    # Recommended fast path: bf16 matmul operands, f32 accumulation/elementwise.
    out_bf16 = actor_forward(x_local, conv_w, conv_b, fc_w, fc_b,
                             compute_dtype=jnp.bfloat16)
    out_bf16 = jax.block_until_ready(out_bf16)
    assert out_bf16.shape == (*env_batch_nagents, action_size), out_bf16.shape
    assert jnp.allclose(out_bf16, ref, atol=3e-2, rtol=3e-2), "bf16 path mismatch"

    # Full-precision path for a tight numerical check of the kernel structure.
    out_f32 = actor_forward(x_local, conv_w, conv_b, fc_w, fc_b,
                            compute_dtype=jnp.float32)
    out_f32 = jax.block_until_ready(out_f32)
    assert out_f32.shape == (*env_batch_nagents, action_size), out_f32.shape
    assert jnp.allclose(out_f32, ref, atol=1e-4, rtol=1e-4), "f32 path mismatch"

    print("KERNEL_OK")
</pallas_src>

<mosaic_0001>
module attributes {stable_mosaic.version = 11 : i64} {
  func.func @_actor_kernel(%arg0: i32, %arg1: memref<6x5x16x7xbf16, #tpu.memory_space<vmem>>, %arg2: memref<5x7x32xbf16, #tpu.memory_space<vmem>>, %arg3: memref<1x32xf32, #tpu.memory_space<vmem>>, %arg4: memref<32x128xbf16, #tpu.memory_space<vmem>>, %arg5: memref<1x128xf32, #tpu.memory_space<vmem>>, %arg6: memref<6x128xf32, #tpu.memory_space<vmem>>) attributes {dimension_semantics = [#tpu.dimension_semantics<parallel>], iteration_bounds = array<i64: 1>, scalar_prefetch = 0 : i64, scratch_operands = 0 : i64, tpu.core_type = #tpu.core_type<tc>, window_params = [{transform_indices = @transform_0, window_bounds = array<i64: 6, 5, 16, 7>}, {pipeline_mode = #tpu.pipeline_mode<synchronous>, transform_indices = @transform_1, window_bounds = array<i64: 5, 7, 32>}, {pipeline_mode = #tpu.pipeline_mode<synchronous>, transform_indices = @transform_2, window_bounds = array<i64: 1, 32>}, {pipeline_mode = #tpu.pipeline_mode<synchronous>, transform_indices = @transform_3, window_bounds = array<i64: 32, 128>}, {pipeline_mode = #tpu.pipeline_mode<synchronous>, transform_indices = @transform_4, window_bounds = array<i64: 1, 128>}, {transform_indices = @transform_5, window_bounds = array<i64: 6, 128>}]} {
    %c0 = arith.constant 0 : index
    %c0_0 = arith.constant 0 : index
    %c0_1 = arith.constant 0 : index
    %c0_2 = arith.constant 0 : index
    %0 = vector.load %arg1[%c0, %c0_0, %c0_1, %c0_2] : memref<6x5x16x7xbf16, #tpu.memory_space<vmem>>, vector<6x1x16x7xbf16>
    %1 = vector.shape_cast %0 : vector<6x1x16x7xbf16> to vector<6x16x7xbf16>
    %2 = vector.shape_cast %1 : vector<6x16x7xbf16> to vector<96x7xbf16>
    %c0_3 = arith.constant 0 : index
    %c0_4 = arith.constant 0 : index
    %c0_5 = arith.constant 0 : index
    %3 = vector.load %arg2[%c0_3, %c0_4, %c0_5] : memref<5x7x32xbf16, #tpu.memory_space<vmem>>, vector<1x7x32xbf16>
    %4 = vector.shape_cast %3 : vector<1x7x32xbf16> to vector<7x32xbf16>
    %cst = arith.constant dense<0.000000e+00> : vector<96x32xf32>
    %5 = tpu.matmul %2, %4, %cst {dimension_numbers = #tpu.dot_dimension_numbers<[1], [0], [0], [1], [0, 0, 1, 1], [], []>} : vector<96x7xbf16>, vector<7x32xbf16>, vector<96x32xf32> -> vector<96x32xf32>
    %c0_6 = arith.constant 0 : index
    %c1 = arith.constant 1 : index
    %c0_7 = arith.constant 0 : index
    %c0_8 = arith.constant 0 : index
    %6 = vector.load %arg1[%c0_6, %c1, %c0_7, %c0_8] : memref<6x5x16x7xbf16, #tpu.memory_space<vmem>>, vector<6x1x16x7xbf16>
    %7 = vector.shape_cast %6 : vector<6x1x16x7xbf16> to vector<6x16x7xbf16>
    %8 = vector.shape_cast %7 : vector<6x16x7xbf16> to vector<96x7xbf16>
    %c1_9 = arith.constant 1 : index
    %c0_10 = arith.constant 0 : index
    %c0_11 = arith.constant 0 : index
    %9 = vector.load %arg2[%c1_9, %c0_10, %c0_11] : memref<5x7x32xbf16, #tpu.memory_space<vmem>>, vector<1x7x32xbf16>
    %10 = vector.shape_cast %9 : vector<1x7x32xbf16> to vector<7x32xbf16>
    %cst_12 = arith.constant dense<0.000000e+00> : vector<96x32xf32>
    %11 = tpu.matmul %8, %10, %cst_12 {dimension_numbers = #tpu.dot_dimension_numbers<[1], [0], [0], [1], [0, 0, 1, 1], [], []>} : vector<96x7xbf16>, vector<7x32xbf16>, vector<96x32xf32> -> vector<96x32xf32>
    %12 = arith.addf %5, %11 : vector<96x32xf32>
    %c0_13 = arith.constant 0 : index
    %c2 = arith.constant 2 : index
    %c0_14 = arith.constant 0 : index
    %c0_15 = arith.constant 0 : index
    %13 = vector.load %arg1[%c0_13, %c2, %c0_14, %c0_15] : memref<6x5x16x7xbf16, #tpu.memory_space<vmem>>, vector<6x1x16x7xbf16>
    %14 = vector.shape_cast %13 : vector<6x1x16x7xbf16> to vector<6x16x7xbf16>
    %15 = vector.shape_cast %14 : vector<6x16x7xbf16> to vector<96x7xbf16>
    %c2_16 = arith.constant 2 : index
    %c0_17 = arith.constant 0 : index
    %c0_18 = arith.constant 0 : index
    %16 = vector.load %arg2[%c2_16, %c0_17, %c0_18] : memref<5x7x32xbf16, #tpu.memory_space<vmem>>, vector<1x7x32xbf16>
    %17 = vector.shape_cast %16 : vector<1x7x32xbf16> to vector<7x32xbf16>
    %cst_19 = arith.constant dense<0.000000e+00> : vector<96x32xf32>
    %18 = tpu.matmul %15, %17, %cst_19 {dimension_numbers = #tpu.dot_dimension_numbers<[1], [0], [0], [1], [0, 0, 1, 1], [], []>} : vector<96x7xbf16>, vector<7x32xbf16>, vector<96x32xf32> -> vector<96x32xf32>
    %19 = arith.addf %12, %18 : vector<96x32xf32>
    %c0_20 = arith.constant 0 : index
    %c3 = arith.constant 3 : index
    %c0_21 = arith.constant 0 : index
    %c0_22 = arith.constant 0 : index
    %20 = vector.load %arg1[%c0_20, %c3, %c0_21, %c0_22] : memref<6x5x16x7xbf16, #tpu.memory_space<vmem>>, vector<6x1x16x7xbf16>
    %21 = vector.shape_cast %20 : vector<6x1x16x7xbf16> to vector<6x16x7xbf16>
    %22 = vector.shape_cast %21 : vector<6x16x7xbf16> to vector<96x7xbf16>
    %c3_23 = arith.constant 3 : index
    %c0_24 = arith.constant 0 : index
    %c0_25 = arith.constant 0 : index
    %23 = vector.load %arg2[%c3_23, %c0_24, %c0_25] : memref<5x7x32xbf16, #tpu.memory_space<vmem>>, vector<1x7x32xbf16>
    %24 = vector.shape_cast %23 : vector<1x7x32xbf16> to vector<7x32xbf16>
    %cst_26 = arith.constant dense<0.000000e+00> : vector<96x32xf32>
    %25 = tpu.matmul %22, %24, %cst_26 {dimension_numbers = #tpu.dot_dimension_numbers<[1], [0], [0], [1], [0, 0, 1, 1], [], []>} : vector<96x7xbf16>, vector<7x32xbf16>, vector<96x32xf32> -> vector<96x32xf32>
    %26 = arith.addf %19, %25 : vector<96x32xf32>
    %c0_27 = arith.constant 0 : index
    %c4 = arith.constant 4 : index
    %c0_28 = arith.constant 0 : index
    %c0_29 = arith.constant 0 : index
    %27 = vector.load %arg1[%c0_27, %c4, %c0_28, %c0_29] : memref<6x5x16x7xbf16, #tpu.memory_space<vmem>>, vector<6x1x16x7xbf16>
    %28 = vector.shape_cast %27 : vector<6x1x16x7xbf16> to vector<6x16x7xbf16>
    %29 = vector.shape_cast %28 : vector<6x16x7xbf16> to vector<96x7xbf16>
    %c4_30 = arith.constant 4 : index
    %c0_31 = arith.constant 0 : index
    %c0_32 = arith.constant 0 : index
    %30 = vector.load %arg2[%c4_30, %c0_31, %c0_32] : memref<5x7x32xbf16, #tpu.memory_space<vmem>>, vector<1x7x32xbf16>
    %31 = vector.shape_cast %30 : vector<1x7x32xbf16> to vector<7x32xbf16>
    %cst_33 = arith.constant dense<0.000000e+00> : vector<96x32xf32>
    %32 = tpu.matmul %29, %31, %cst_33 {dimension_numbers = #tpu.dot_dimension_numbers<[1], [0], [0], [1], [0, 0, 1, 1], [], []>} : vector<96x7xbf16>, vector<7x32xbf16>, vector<96x32xf32> -> vector<96x32xf32>
    %33 = arith.addf %26, %32 : vector<96x32xf32>
    %c0_34 = arith.constant 0 : index
    %c0_35 = arith.constant 0 : index
    %34 = vector.load %arg3[%c0_34, %c0_35] : memref<1x32xf32, #tpu.memory_space<vmem>>, vector<1x32xf32>
    %35 = vector.broadcast %34 : vector<1x32xf32> to vector<96x32xf32>
    %36 = arith.addf %33, %35 : vector<96x32xf32>
    %37 = math.tanh %36 : vector<96x32xf32>
    %38 = vector.shape_cast %37 : vector<96x32xf32> to vector<6x16x32xf32>
    %cst_36 = arith.constant dense<0.000000e+00> : vector<6x32xf32>
    %39 = vector.multi_reduction <add>, %38, %cst_36 [1] : vector<6x16x32xf32> to vector<6x32xf32>
    %cst_37 = arith.constant 1.600000e+01 : f32
    %40 = vector.broadcast %cst_37 : f32 to vector<6x32xf32>
    %41 = arith.divf %39, %40 : vector<6x32xf32>
    %42 = math.tanh %41 : vector<6x32xf32>
    %43 = arith.truncf %42 : vector<6x32xf32> to vector<6x32xbf16>
    %c0_38 = arith.constant 0 : index
    %c0_39 = arith.constant 0 : index
    %44 = vector.load %arg4[%c0_38, %c0_39] : memref<32x128xbf16, #tpu.memory_space<vmem>>, vector<32x128xbf16>
    %cst_40 = arith.constant dense<0.000000e+00> : vector<6x128xf32>
    %45 = tpu.matmul %43, %44, %cst_40 {dimension_numbers = #tpu.dot_dimension_numbers<[1], [0], [0], [1], [0, 0, 1, 1], [], []>} : vector<6x32xbf16>, vector<32x128xbf16>, vector<6x128xf32> -> vector<6x128xf32>
    %c0_41 = arith.constant 0 : index
    %c0_42 = arith.constant 0 : index
    %46 = vector.load %arg5[%c0_41, %c0_42] : memref<1x128xf32, #tpu.memory_space<vmem>>, vector<1x128xf32>
    %47 = vector.broadcast %46 : vector<1x128xf32> to vector<6x128xf32>
    %48 = arith.addf %45, %47 : vector<6x128xf32>
    %c0_43 = arith.constant 0 : index
    %c0_44 = arith.constant 0 : index
    %49 = vector.load %arg6[%c0_43, %c0_44] : memref<6x128xf32, #tpu.memory_space<vmem>>, vector<6x128xf32>
    tpu.vector_store %arg6[%c0_43, %c0_44], %48 {strides = array<i32>} : memref<6x128xf32, #tpu.memory_space<vmem>>, vector<6x128xf32>,
    return
  }
  func.func @transform_0(%arg0: i32) -> (i32, i32, i32, i32) {
    %c0_i32 = arith.constant 0 : i32
    %c0_i32_0 = arith.constant 0 : i32
    %c0_i32_1 = arith.constant 0 : i32
    %c0_i32_2 = arith.constant 0 : i32
    return %arg0, %c0_i32, %c0_i32_0, %c0_i32_1 : i32, i32, i32, i32
  }
  func.func @transform_1(%arg0: i32) -> (i32, i32, i32) {
    %c0_i32 = arith.constant 0 : i32
    %c0_i32_0 = arith.constant 0 : i32
    %c0_i32_1 = arith.constant 0 : i32
    %c0_i32_2 = arith.constant 0 : i32
    return %c0_i32, %c0_i32_0, %c0_i32_1 : i32, i32, i32
  }
  func.func @transform_2(%arg0: i32) -> (i32, i32) {
    %c0_i32 = arith.constant 0 : i32
    %c0_i32_0 = arith.constant 0 : i32
    %c0_i32_1 = arith.constant 0 : i32
    return %c0_i32, %c0_i32_0 : i32, i32
  }
  func.func @transform_3(%arg0: i32) -> (i32, i32) {
    %c0_i32 = arith.constant 0 : i32
    %c0_i32_0 = arith.constant 0 : i32
    %c0_i32_1 = arith.constant 0 : i32
    return %c0_i32, %c0_i32_0 : i32, i32
  }
  func.func @transform_4(%arg0: i32) -> (i32, i32) {
    %c0_i32 = arith.constant 0 : i32
    %c0_i32_0 = arith.constant 0 : i32
    %c0_i32_1 = arith.constant 0 : i32
    return %c0_i32, %c0_i32_0 : i32, i32
  }
  func.func @transform_5(%arg0: i32) -> (i32, i32) {
    %c0_i32 = arith.constant 0 : i32
    %c0_i32_0 = arith.constant 0 : i32
    return %arg0, %c0_i32 : i32, i32
  }
}

</mosaic_0001>

<bundles_post_ra>
// kernel: tpu_custom_call.1
= control target key start
LH: loop header
LB: loop body
LE: loop exit
PB: predicated region body
PF: predicated region fallthrough
CT: control target
= control target key end

     0   :  { %vm99_vm0 = vcmask 1042432   ;;  %vm100_vm1 = vcmask 1043456   ;;  %v1384_v2 = vmov 65535   ;;  %vm80_vm2 = vcmask 56320   ;;  %s1590_s0 = inlined_call_operand.vmem [shape: bf16[6,5,16,7], index: 0, kind: input, shape index: {}]   ;;  %s1591_s1 = inlined_call_operand.vmem [shape: bf16[5,7,32], index: 1, kind: input, shape index: {}]   ;;  %s1592_s2 = inlined_call_operand.vmem [shape: f32[1,32], index: 2, kind: input, shape index: {}]   ;;  %s1593_s3 = inlined_call_operand.vmem [shape: bf16[32,128], index: 3, kind: input, shape index: {}]   ;;  %s1594_s4 = inlined_call_operand.vmem [shape: f32[1,128], index: 4, kind: input, shape index: {}]   ;;  %s1595_s5 = inlined_call_operand.hbm [shape: f32[6,128], index: 5, kind: output, shape index: {}]  }
   0x1   :  { %v1017_v0 = vld [vmem:[%s1591_s1 + $0x4] sm:$0xf]  ;;  %v1292_v1 = vld [vmem:[%s1590_s0 + $0x8] sm:$0xff]   ;;  %v101_v3 = vsel %vm99_vm0, 4294967295, %v1384_v2  ;;  %v1293_v6 = vld [vmem:[%s1590_s0 + $0x10] sm:$0xff]  }
   0x2   :  { %v1054_v4 = vld [vmem:[%s1591_s1 + $0x8] sm:$0xf]  ;;  %v102_v5 = vsel %vm100_vm1, %v101_v3, 0  ;;  %1162 = vmatprep.mubr.msk.bf16.mxu1 %vm80_vm2, %v1292_v1  ;;  %1190 = vmatprep.mubr.msk.bf16.mxu0 %vm80_vm2, %v1293_v6  ;;  %v1294_v9 = vld [vmem:[%s1590_s0 + $0x30] sm:$0xff]   ;;  %v1295_v10 = vld [vmem:[%s1590_s0 + $0x38] sm:$0xff]  }
   0x3   :  { %v104_v7 = vand.u32 %v1017_v0, %v102_v5  ;;  %v383_v8 = vand.u32 %v1054_v4, %v102_v5  ;;  %v1079_v11 = vld [vmem:[%s1591_s1 + $0xc] sm:$0xf]  ;;  %v34_v12 = vld [vmem:[%s1591_s1] sm:$0xf]  ;;  %v1296_v15 = vld [vmem:[%s1590_s0 + $0x58] sm:$0xff]  }
   0x4   :  { %v542_v13 = vand.u32 %v1079_v11, %v102_v5  ;;  %v236_v14 = vand.u32 %v102_v5, %v34_v12  ;;  %v1297_v16 = vld [vmem:[%s1590_s0 + $0x60] sm:$0xff]   ;;  %v1299_v18 = vld [vmem:[%s1590_s0 + $0x88] sm:$0xff]   ;;  %v1301_v20 = vld [vmem:[%s1590_s0 + $0x18] sm:$0xff]  }
   0x5   :  { %1160 = vmatprep.subr.bf16.mxu1 %v104_v7  ;;  %1188 = vmatprep.subr.bf16.mxu0 %v383_v8  ;;  %v1298_v17 = vld [vmem:[%s1590_s0 + $0x80] sm:$0xff]   ;;  %v1300_v19 = vld [vmem:[%s1590_s0 + $0xa8] sm:$0xff]   ;;  %v1104_v21 = vld [vmem:[%s1591_s1 + $0x10] sm:$0xf] }
   0x6   :  { %1161 = vmatpush3.bf16.msra.mxu1 %v104_v7  ;;  %1189 = vmatpush3.bf16.msra.mxu0 %v383_v8  ;;  %v701_v22 = vand.u32 %v1104_v21, %v102_v5  ;;  %v1302_v23 = vld [vmem:[%s1590_s0 + $0xd0] sm:$0xff]   ;;  %v1303_v24 = vld [vmem:[%s1590_s0 + $0x40] sm:$0xff]   ;;  %v1305_v26 = vld [vmem:[%s1590_s0 + $0x68] sm:$0xff]  }
   0x7   :  { %1202 = vmatprep.subr.bf16.mxu0 %v542_v13  ;;  %1174 = vmatprep.subr.bf16.mxu1 %v236_v14  ;;  %v1304_v25 = vld [vmem:[%s1590_s0] sm:$0xff]   ;;  %v1306_v27 = vld [vmem:[%s1590_s0 + $0x28] sm:$0xff]   ;;  %v1307_v28 = vld [vmem:[%s1590_s0 + $0x90] sm:$0xff]  }
   0x8   :  { %v1308_v29 = vld [vmem:[%s1590_s0 + $0x50] sm:$0xff]   ;;  %v1309_v30 = vld [vmem:[%s1590_s0 + $0xb8] sm:$0xff]  }
   0x9   :  { %1163 = vmatmul.mubr.msk.bf16.vlgmr.msra.gmra.mrb[0].mxu1 %vm80_vm2, %v1294_v9  ;;  %1191 = vmatmul.mubr.msk.bf16.vlgmr.msra.gmra.mrb[0].mxu0 %vm80_vm2, %v1295_v10 }
   0xa   :  { %1203 = vmatpush3.bf16.msra.mxu0 %v542_v13  ;;  %1175 = vmatpush3.bf16.msra.mxu1 %v236_v14 }
   0xb   :  { %1166 = vmatprep.mubr.msk.bf16.mxu1 %vm80_vm2, %v1296_v15  ;;  %1194 = vmatprep.mubr.msk.bf16.mxu0 %vm80_vm2, %v1297_v16 }
   0xc   :  { %1238 = vmatprep.subr.bf16.mxu1 %v383_v8  ;;  %1216 = vmatprep.subr.bf16.mxu0 %v701_v22 }
  0x11   :  { %1167 = vmatmul.mubr.msk.bf16.gmra.mrb[4].mxu1 %vm80_vm2, %v1298_v17  ;;  %1195 = vmatmul.mubr.msk.bf16.gmra.mrb[4].mxu0 %vm80_vm2, %v1299_v18 }
  0x12   :  { %1170 = vmatprep.mubr.msk.bf16.mxu1 %vm80_vm2, %v1300_v19  ;;  %1204 = vmatprep.mubr.msk.bf16.mxu0 %vm80_vm2, %v1301_v20 }
  0x19   :  { %1171 = vmatmul.mubr.msk.bf16.gmra.mrb[8].mxu1 %vm80_vm2, %v1302_v23  ;;  %1205 = vmatmul.mubr.msk.bf16.vlgmr.msra.gmra.mrb[0].mxu0 %vm80_vm2, %v1303_v24 }
  0x1a   :  { %1217 = vmatpush3.bf16.msra.mxu0 %v701_v22  ;;  %1176 = vmatprep.mubr.msk.bf16.mxu1 %vm80_vm2, %v1304_v25 }
  0x1b   :  { %1208 = vmatprep.mubr.msk.bf16.mxu0 %vm80_vm2, %v1305_v26 }
  0x21   :  { %1177 = vmatmul.mubr.msk.bf16.vlgmr.msra.gmra.mrb[0].mxu1 %vm80_vm2, %v1306_v27  ;;  %1209 = vmatmul.mubr.msk.bf16.gmra.mrb[4].mxu0 %vm80_vm2, %v1307_v28 }
  0x22   :  { %10 = vsyncpa [#allocation3], 0  ;;  %1239 = vmatpush3.bf16.msra.mxu1 %v383_v8  ;;  %1180 = vmatprep.mubr.msk.bf16.mxu1 %vm80_vm2, %v1308_v29  ;;  %v1310_v31 = vld [vmem:[%s1590_s0 + $0x78] sm:$0xff]   ;;  %v1311_v32 = vld [vmem:[%s1590_s0 + $0xe0] sm:$0xff]   ;;  %v1385_v44 = vmov 0.0   ;;  %vm1386_vm3 = vmmov 0  }
  0x23   :  { %1212 = vmatprep.mubr.msk.bf16.mxu0 %vm80_vm2, %v1309_v30  ;;  %v1312_v33 = vld [vmem:[%s1590_s0 + $0xa0] sm:$0xff]   ;;  %v1314_v35 = vld [vmem:[%s1590_s0 + $0xc8] sm:$0xff]   ;;  %v1316_v37 = vld [vmem:[%s1590_s0 + $0x70] sm:$0xff]   ;;  %1230 = vmatprep.subr.bf16.mxu1 %v1385_v44  ;;  %vm827_vm4 = vcmask 261120   ;;  %vm924_vm5 = vcmask 1041409   ;;  %vm926_vm6 = vcmask 1042434  }
  0x24   :  { %v1313_v34 = vld [vmem:[%s1590_s0 + $0x20] sm:$0xff]   ;;  %v1315_v36 = vld [vmem:[%s1590_s0 + $0x48] sm:$0xff]   ;;  %v1318_v38 = vld [vmem:[%s1590_s0 + $0xb0] sm:$0xff]   ;;  %vm928_vm7 = vcmask 1043459   ;;  %vm930_vm8 = vcmask 1044484   ;;  %vm932_vm9 = vcmask 1045509  }
  0x25   :  { %v1317_v39 = vld [vmem:[%s1590_s0 + $0x98] sm:$0xff]   ;;  %v1320_v40 = vld [vmem:[%s1590_s0 + $0xc0] sm:$0xff]   ;;  %v1321_v42 = vld [vmem:[%s1590_s0 + $0xe8] sm:$0xff]   ;;  %s1387_s16 = smov [#allocation2]  }
  0x26   :  { %v1319_v41 = vld [vmem:[%s1590_s0 + $0xd8] sm:$0xff]   ;;  %v1322_v43 = vld [vmem:[%s1593_s3] sm:$0xff]   ;;  %v1323_v45 = vld [vmem:[%s1593_s3 + $0x8] sm:$0xff]   ;;  %s997_s17 = sshll.u32 %s1387_s16, 4  ;;  %s998_s17 = int_to_ptr.vmem [resolvable:$true] %s997_s17 }
  0x27   :  { %v1117_v55 = vld [vmem:[%s1592_s2] ss:$0 sm:$0xff]  ;;  %s1360_s18 = scalar_lea.vmem %s998_s17, 128  ;;  %p1365_p1 = scmp.lt.s32.totalorder %s998_s17, %s998_s17 }
  0x28   :  { %p1361_p0 = scmp.ne.s32.totalorder %s998_s17, %s1360_s18  ;;  %p1366_p2 = scmp.lt.s32.totalorder %s1360_s18, %s1360_s18 }
  0x29   :  { %1181 = vmatmul.mubr.msk.bf16.gmra.mrb[4].mxu1 %vm80_vm2, %v1310_v31  ;;  %1213 = vmatmul.mubr.msk.bf16.gmra.mrb[8].mxu0 %vm80_vm2, %v1311_v32 }
  0x2a   :  { %1184 = vmatprep.mubr.msk.bf16.mxu1 %vm80_vm2, %v1312_v33  ;;  %1218 = vmatprep.mubr.msk.bf16.mxu0 %vm80_vm2, %v1313_v34  ;;  %p1367_p3 = por %p1366_p2, %p1365_p1 }
  0x2c   :  { %p1368_p4 = pnand %p1367_p3, %p1361_p0 }
  0x31   :  { %1185 = vmatmul.mubr.msk.bf16.gmra.mrb[8].mxu1 %vm80_vm2, %v1314_v35  ;;  %1219 = vmatmul.mubr.msk.bf16.vlgmr.msra.gmra.mrb[0].mxu0 %vm80_vm2, %v1315_v36 }
  0x32   :  { %1222 = vmatprep.mubr.msk.bf16.mxu0 %vm80_vm2, %v1316_v37  ;;  %1198 = vmatprep.mubr.msk.bf16.mxu1 %vm80_vm2, %v1318_v38 }
  0x39   :  { %1223 = vmatmul.mubr.msk.bf16.gmra.mrb[4].mxu0 %vm80_vm2, %v1317_v39 }
  0x3a   :  { %1226 = vmatprep.mubr.msk.bf16.mxu0 %vm80_vm2, %v1320_v40 }
  0x3d   :  { %1199 = vmatmul.mubr.msk.bf16.vlgmr.msra.gmra.mrb[8].mxu1 %vm80_vm2, %v1319_v41 }
  0x3e   :  { %1234 = vmatprep.mubr.msk.bf16.mxu1 %vm1386_vm3, %v1385_v44  ;;  %1231 = vmatpush3.bf16.msra.mxu1 %v1322_v43 }
  0x3f   :  { %1232 = vmatprep.subr.bf16.mxu1 %v1385_v44 }
  0x41   :  { %1227 = vmatmul.mubr.msk.bf16.gmra.mrb[8].mxu0 %vm80_vm2, %v1321_v42 }
  0x42   :  { %1233 = vmatpush3.bf16.msra.mxu1 %v1323_v45 }
  0xf4   :  { %v1178_v46 = vpop.f32.mrb[0].mxu1 }
  0xf5   :  { %v272_v47 = vpop.f32.mrb[1].mxu1 }
  0xf6   :  { %v1179_v48 = vpop.f32.mrb[2].mxu1 }
  0xf7   :  { %v275_v49 = vpop.f32.mrb[3].mxu1 }
  0xfc   :  { %v1182_v50 = vpop.f32.mrb[4].mxu1 }
  0xfd   :  { %v288_v51 = vpop.f32.mrb[5].mxu1 }
  0xfe   :  { %v1183_v52 = vpop.f32.mrb[6].mxu1 }
  0xff   :  { %v291_v53 = vpop.f32.mrb[7].mxu1 }
 0x104   :  { %v1220_v54 = vpop.f32.mrb[0].mxu0 }
 0x105   :  { %v1240_v56 = vadd.f32 %v1220_v54, %v1178_v46  ;;  %v737_v57 = vpop.f32.mrb[1].mxu0 }
 0x106   :  { %v1241_v58 = vadd.f32 %v737_v57, %v272_v47  ;;  %v1221_v59 = vpop.f32.mrb[2].mxu0 }
 0x107   :  { %v805_v60 = vadd.f32 %v1240_v56, %v1117_v55  ;;  %v1242_v61 = vadd.f32 %v1221_v59, %v1179_v48  ;;  %v740_v62 = vpop.f32.mrb[3].mxu0 }
 0x108   :  { %v803_v63 = vadd.f32 %v1241_v58, %v1117_v55  ;;  %v1243_v0 = vadd.f32 %v740_v62, %v275_v49 }
 0x109   :  { %1324 = vtanh.f32 %v805_v60  ;;  %v806_v1 = vadd.f32 %v1242_v61, %v1117_v55 }
 0x10a   :  { %1326 = vtanh.f32 %v803_v63  ;;  %v804_v2 = vadd.f32 %v1243_v0, %v1117_v55 }
 0x10b   :  { %1328 = vtanh.f32 %v806_v1 }
 0x10c   :  { %1330 = vtanh.f32 %v804_v2  ;;  %v1224_v3 = vpop.f32.mrb[4].mxu0 }
 0x10d   :  { %v1244_v4 = vadd.f32 %v1224_v3, %v1182_v50  ;;  %v753_v5 = vpop.f32.mrb[5].mxu0 }
 0x10e   :  { %v1245_v6 = vadd.f32 %v753_v5, %v288_v51  ;;  %v1225_v7 = vpop.f32.mrb[6].mxu0 }
 0x10f   :  { %v809_v8 = vadd.f32 %v1244_v4, %v1117_v55  ;;  %v1246_v9 = vadd.f32 %v1225_v7, %v1183_v52  ;;  %v756_v10 = vpop.f32.mrb[7].mxu0 }
 0x110   :  { %v807_v11 = vadd.f32 %v1245_v6, %v1117_v55  ;;  %v1247_v12 = vadd.f32 %v756_v10, %v291_v53  ;;  %v1200_v13 = vpop.f32.mrb[8].mxu1 }
 0x111   :  { %1332 = vtanh.f32 %v809_v8  ;;  %v810_v14 = vadd.f32 %v1246_v9, %v1117_v55  ;;  %v451_v15 = vpop.f32.mrb[9].mxu1 }
 0x112   :  { %1334 = vtanh.f32 %v807_v11  ;;  %v808_v16 = vadd.f32 %v1247_v12, %v1117_v55  ;;  %v1201_v17 = vpop.f32.mrb[10].mxu1 }
 0x113   :  { %v1325_v18 = vpop.eup %1324  ;;  %1336 = vtanh.f32 %v810_v14  ;;  %v454_v19 = vpop.f32.mrb[11].mxu1 }
 0x114   :  { %v1327_v20 = vpop.eup %1326  ;;  %1338 = vtanh.f32 %v808_v16  ;;  %v1228_v21 = vpop.f32.mrb[8].mxu0  ;;  %v837_v26 = vsel %vm827_vm4, %v1325_v18, 0.0 }
 0x115   :  { %v1329_v22 = vpop.eup %1328  ;;  %v1248_v23 = vadd.f32 %v1228_v21, %v1200_v13  ;;  %v769_v24 = vpop.f32.mrb[9].mxu0  ;;  %v828_v27 = vsel %vm827_vm4, %v1327_v20, 0.0 }
 0x116   :  { %v1331_v25 = vpop.eup %1330  ;;  %v838_v28 = vsel %vm827_vm4, %v1329_v22, 0.0  ;;  %v1249_v29 = vadd.f32 %v769_v24, %v451_v15  ;;  %v1229_v30 = vpop.f32.mrb[10].mxu0 }
 0x117   :  { %v839_v31 = vadd.f32 %v838_v28, %v837_v26  ;;  %v829_v32 = vsel %vm827_vm4, %v1331_v25, 0.0  ;;  %v813_v33 = vadd.f32 %v1248_v23, %v1117_v55  ;;  %v1250_v34 = vadd.f32 %v1229_v30, %v1201_v17  ;;  %v772_v35 = vpop.f32.mrb[11].mxu0 }
 0x118   :  { %v830_v36 = vadd.f32 %v829_v32, %v828_v27  ;;  %v811_v37 = vadd.f32 %v1249_v29, %v1117_v55  ;;  %v1251_v38 = vadd.f32 %v772_v35, %v454_v19 }
 0x119   :  { %v840_v39 = vrot.slane %v839_v31, 4  ;;  %1340 = vtanh.f32 %v813_v33  ;;  %v814_v40 = vadd.f32 %v1250_v34, %v1117_v55 }
 0x11a   :  { %v831_v41 = vrot.slane %v830_v36, 4  ;;  %1342 = vtanh.f32 %v811_v37  ;;  %v812_v42 = vadd.f32 %v1251_v38, %v1117_v55 }
 0x11b   :  { %v1333_v43 = vpop.eup %1332  ;;  %v841_v44 = vadd.f32 %v840_v39, %v839_v31  ;;  %1344 = vtanh.f32 %v814_v40 }
 0x11c   :  { %v1335_v45 = vpop.eup %1334  ;;  %v832_v46 = vadd.f32 %v831_v41, %v830_v36  ;;  %1346 = vtanh.f32 %v812_v42  ;;  %v855_v51 = vsel %vm827_vm4, %v1333_v43, 0.0 }
 0x11d   :  { %v1337_v47 = vpop.eup %1336  ;;  %v842_v48 = vrot.slane %v841_v44, 2  ;;  %v846_v54 = vsel %vm827_vm4, %v1335_v45, 0.0 }
 0x11e   :  { %v1339_v49 = vpop.eup %1338  ;;  %v833_v50 = vrot.slane %v832_v46, 2  ;;  %v856_v52 = vsel %vm827_vm4, %v1337_v47, 0.0 }
 0x11f   :  { %v843_v53 = vadd.f32 %v842_v48, %v841_v44  ;;  %v857_v56 = vadd.f32 %v856_v52, %v855_v51  ;;  %v847_v55 = vsel %vm827_vm4, %v1339_v49, 0.0 }
 0x120   :  { %v834_v57 = vadd.f32 %v833_v50, %v832_v46  ;;  %v848_v58 = vadd.f32 %v847_v55, %v846_v54 }
 0x121   :  { %v844_v59 = vrot.slane %v843_v53, 1  ;;  %v858_v60 = vrot.slane %v857_v56, 4 }
 0x122   :  { %v835_v61 = vrot.slane %v834_v57, 1  ;;  %v849_v62 = vrot.slane %v848_v58, 4 }
 0x123   :  { %v1341_v63 = vpop.eup %1340  ;;  %v845_v0 = vadd.f32 %v844_v59, %v843_v53  ;;  %v859_v1 = vadd.f32 %v858_v60, %v857_v56 }
 0x124   :  { %v1343_v2 = vpop.eup %1342  ;;  %v836_v3 = vadd.f32 %v835_v61, %v834_v57  ;;  %v850_v4 = vadd.f32 %v849_v62, %v848_v58  ;;  %v873_v8 = vsel %vm827_vm4, %v1341_v63, 0.0  ;;  %v1118_v63 = vld [vmem:[%s1594_s4] ss:$0 sm:$0xff] }
 0x125   :  { %v1345_v5 = vpop.eup %1344  ;;  %v884_v6 = vmul.f32 0.0625, %v845_v0  ;;  %v860_v7 = vrot.slane %v859_v1, 2  ;;  %v864_v12 = vsel %vm827_vm4, %v1343_v2, 0.0 }
 0x126   :  { %v1347_v9 = vpop.eup %1346  ;;  %v883_v10 = vmul.f32 0.0625, %v836_v3  ;;  %v851_v11 = vrot.slane %v850_v4, 2  ;;  %v874_v13 = vsel %vm827_vm4, %v1345_v5, 0.0 }
 0x127   :  { %1348 = vtanh.f32 %v884_v6  ;;  %v861_v14 = vadd.f32 %v860_v7, %v859_v1  ;;  %v875_v15 = vadd.f32 %v874_v13, %v873_v8  ;;  %v865_v16 = vsel %vm827_vm4, %v1347_v9, 0.0 }
 0x128   :  { %1350 = vtanh.f32 %v883_v10  ;;  %v852_v17 = vadd.f32 %v851_v11, %v850_v4  ;;  %v866_v18 = vadd.f32 %v865_v16, %v864_v12 }
 0x129   :  { %v862_v19 = vrot.slane %v861_v14, 1  ;;  %v876_v20 = vrot.slane %v875_v15, 4 }
 0x12a   :  { %v853_v21 = vrot.slane %v852_v17, 1  ;;  %v867_v22 = vrot.slane %v866_v18, 4 }
 0x12b   :  { %v863_v23 = vadd.f32 %v862_v19, %v861_v14  ;;  %v877_v24 = vadd.f32 %v876_v20, %v875_v15 }
 0x12c   :  { %v854_v25 = vadd.f32 %v853_v21, %v852_v17  ;;  %v868_v26 = vadd.f32 %v867_v22, %v866_v18 }
 0x12d   :  { %v886_v27 = vmul.f32 0.0625, %v863_v23  ;;  %v878_v28 = vrot.slane %v877_v24, 2 }
 0x12e   :  { %v885_v29 = vmul.f32 0.0625, %v854_v25  ;;  %v869_v30 = vrot.slane %v868_v26, 2 }
 0x12f   :  { %1352 = vtanh.f32 %v886_v27  ;;  %v879_v31 = vadd.f32 %v878_v28, %v877_v24 }
 0x130   :  { %1354 = vtanh.f32 %v885_v29  ;;  %v870_v32 = vadd.f32 %v869_v30, %v868_v26 }
 0x131   :  { %v1349_v33 = vpop.eup %1348  ;;  %v880_v34 = vrot.slane %v879_v31, 1 }
 0x132   :  { %v1351_v35 = vpop.eup %1350  ;;  %v896_v36 = vpack.c.bf16 %v1349_v33, %v1349_v33  ;;  %v871_v37 = vrot.slane %v870_v32, 1 }
 0x133   :  { %v895_v38 = vpack.c.bf16 %v1351_v35, %v1351_v35  ;;  %v881_v39 = vadd.f32 %v880_v34, %v879_v31 }
 0x134   :  { %v919_v40 = vunpack.c.l.b16 %v896_v36  ;;  %v872_v41 = vadd.f32 %v871_v37, %v870_v32 }
 0x135   :  { %v918_v42 = vunpack.c.l.b16 %v895_v38  ;;  %v888_v43 = vmul.f32 0.0625, %v881_v39 }
 0x136   :  { %v887_v44 = vmul.f32 0.0625, %v872_v41 }
 0x137   :  { %1356 = vtanh.f32 %v888_v43  ;;  %v925_v45 = vsel %vm924_vm5, %v919_v40, %v918_v42 }
 0x138   :  { %1358 = vtanh.f32 %v887_v44 }
 0x139   :  { %v1353_v46 = vpop.eup %1352 }
 0x13a   :  { %v1355_v47 = vpop.eup %1354  ;;  %v898_v48 = vpack.c.bf16 %v1353_v46, %v1353_v46 }
 0x13b   :  { %v897_v49 = vpack.c.bf16 %v1355_v47, %v1355_v47 }
 0x13c   :  { %v921_v51 = vunpack.c.l.b16 %v898_v48 }
 0x13d   :  { %v920_v50 = vunpack.c.l.b16 %v897_v49 }
 0x13f   :  { %v927_v52 = vsel %vm926_vm6, %v920_v50, %v925_v45 }
 0x140   :  { %v929_v53 = vsel %vm928_vm7, %v921_v51, %v927_v52 }
 0x141   :  { %v1357_v54 = vpop.eup %1356 }
 0x142   :  { %v1359_v56 = vpop.eup %1358  ;;  %v900_v55 = vpack.c.bf16 %v1357_v54, %v1357_v54 }
 0x143   :  { %v899_v57 = vpack.c.bf16 %v1359_v56, %v1359_v56 }
 0x144   :  { %v923_v59 = vunpack.c.l.b16 %v900_v55 }
 0x145   :  { %v922_v58 = vunpack.c.l.b16 %v899_v57 }
 0x147   :  { %v931_v60 = vsel %vm930_vm8, %v922_v58, %v929_v53 }
 0x148   :  { %v933_v61 = vsel %vm932_vm9, %v923_v59, %v931_v60 }
 0x149   :  { %v934_v62 = vpack.c.b16 %v933_v61, %v933_v61 }
 0x14b   :  { %1235 = vmatmul.mubr.msk.bf16.vlgmr.msra.gmra.mrb[12].mxu1 %vm827_vm4, %v934_v62 }
 0x21e   :  { %v984_v0 = vpop.f32.mrb[12].mxu1 }
 0x21f   :  { %v985_v1 = vadd.f32 %v1118_v63, %v984_v0  ;;  %v1236_v2 = vpop.f32.mrb[13].mxu1 }
 0x220   :  { %v987_v3 = vpop.f32.mrb[14].mxu1 }
 0x221   :  { %990 = vst [vmem:[#allocation2] sm:$0x3f] %v985_v1  ;;  %v1237_v4 = vpop.f32.mrb[15].mxu1 }
 0x222   :  { %1371 = shalt.err (!%p1368_p4)
}
 0x223   :  { %s1372_s4 = scalar_lea.hbm %s1595_s5, 128 }
 0x224   :  { %p1373_p5 = scmp.ne.s32.totalorder %s1595_s5, %s1372_s4  ;;  %p1376_p6 = scmp.lt.u32.totalorder %s1372_s4, %s1595_s5 }
 0x226   :  { %p1378_p7 = pnand %p1376_p6, %p1373_p5 }
 0x228   :  { %1381 = shalt.err (!%p1378_p7)
}
 0x229   :  { %1000 = dma.vmem_to_hbm [thread:$0]  %s998_s17, 128, %s1595_s5, [#allocation3]  }
 0x22a   :  { %1382 = dma.done.wait [#allocation3], 128  }
 0x22b   :  { %1383 = vsyncadd [#allocation3], 4294967168 }
 0x22c   :  { %1004 = vsyncpa [#allocation3], 1 }

</bundles_post_ra>
